<compile_context>
chip_gen: v6e
topology: v6e:2x2x1
jax: 0.10.0
libtpu: 0.0.40
codegen_flags: <defaults>
</compile_context>

<pallas_src>
import functools

import jax
import jax.numpy as jnp
from jax.experimental import pallas as pl
from jax.experimental.pallas import tpu as pltpu


def _round_up(x, m):
    return (x + m - 1) // m * m


# ----------------------------------------------------------------------------
# Pallas kernel: fused deconv(2x2,s2) + ReLU + fused (mask|char) 1x1 conv.
# ----------------------------------------------------------------------------
def _predictor_kernel(x_ref, wd_ref, bd_ref, wf_ref, bf_ref, o_ref):
    # x_ref : (TP, Cin)          bf16 pixel tile
    # wd_ref: (Cin, 4*Cout)      bf16 deconv weight, cols ordered (kh, kw, cout)
    # bd_ref: (1, 4*Cout)        f32 deconv bias (tiled per slot)
    # wf_ref: (4*Cout, 4*Cpad)   bf16 block-diag fused 1x1 weight (mask|char, 0-padded)
    # bf_ref: (1, 4*Cpad)        f32 fused bias
    # o_ref : (TP, 4*Cpad)       f32 fused logits, cols ordered (kh, kw, class)
    y = jnp.dot(x_ref[...], wd_ref[...], preferred_element_type=jnp.float32)
    y = jnp.maximum(y + bd_ref[...], 0.0)  # bias + ReLU in f32
    o_ref[...] = (
        jnp.dot(y.astype(wf_ref.dtype), wf_ref[...],
                preferred_element_type=jnp.float32)
        + bf_ref[...])


# ----------------------------------------------------------------------------
# Parameter packing (done ONCE, outside the per-call forward).
# ----------------------------------------------------------------------------
def pack_params(params, param_dtype=jnp.bfloat16):
    deconv_w = params["deconv_w"]   # (Cin, Cout, 2, 2)  ConvTranspose2d layout
    deconv_b = params["deconv_b"]   # (Cout,)
    mask_w   = params["mask_w"]     # (1, Cout, 1, 1)    Conv2d layout
    mask_b   = params["mask_b"]     # (1,)
    char_w   = params["char_w"]     # (Cchar, Cout, 1, 1)
    char_b   = params["char_b"]     # (Cchar,)

    KK = 4  # 2x2 deconv slots
    Cin, Cout = deconv_w.shape[0], deconv_w.shape[1]
    Cchar = char_w.shape[0]
    Call = 1 + Cchar                      # mask class + char classes, fused
    Cpad = _round_up(Call, 32)            # 4*Cpad is a multiple of 128 lanes

    # deconv weight (Cin, Cout, kh, kw) -> (Cin, kh, kw, Cout) -> (Cin, 4*Cout)
    wd = jnp.transpose(deconv_w, (0, 2, 3, 1)).reshape(Cin, KK * Cout)
    bd = jnp.tile(deconv_b, KK).reshape(1, KK * Cout)

    # fused 1x1 conv: classes = [mask | char], as (Cout, Call), zero-pad to Cpad,
    # then block-diagonal over the 4 (kh,kw) slots.
    w_all = jnp.concatenate(
        [mask_w.reshape(1, Cout), char_w.reshape(Cchar, Cout)], axis=0).T  # (Cout, Call)
    w_all = jnp.pad(w_all, ((0, 0), (0, Cpad - Call)))
    wf = jnp.kron(jnp.eye(KK, dtype=w_all.dtype), w_all)                   # (4*Cout, 4*Cpad)
    b_all = jnp.pad(jnp.concatenate([mask_b, char_b]), (0, Cpad - Call))
    bf = jnp.tile(b_all, KK).reshape(1, KK * Cpad)

    return {
        "wd": wd.astype(param_dtype),
        "bd": bd.astype(jnp.float32),
        "wf": wf.astype(param_dtype),
        "bf": bf.astype(jnp.float32),
    }


# ----------------------------------------------------------------------------
# Forward wrapper: NCHW <-> pixel-rows plumbing + pallas_call.
# ----------------------------------------------------------------------------
@functools.partial(jax.jit, static_argnames=("num_char_classes", "max_tile_p"))
def char_mask_rcnn_c4_predictor(x_nchw, packed, *, num_char_classes,
                                max_tile_p=2048):
    wd, bd, wf, bf = packed["wd"], packed["bd"], packed["wf"], packed["bf"]

    N, Cin, H, W = x_nchw.shape
    KK = 4
    Cout = wd.shape[1] // KK
    Cpad = wf.shape[1] // KK
    Call = 1 + num_char_classes
    assert wd.shape[0] == Cin

    # ---- pixels as rows; big tiles amortize per-step pipeline overhead, but
    # keep >= 2 grid steps so the "parallel" axis can shard over v7x's 2 TCs.
    P = N * H * W
    tile_p = max(8, min(max_tile_p, _round_up(-(-P // 2), 8)))
    pad_rows = (-P) % tile_p
    Pp = P + pad_rows

    # NCHW -> (pixels, Cin), bf16 (halves HBM reads; f32 accumulation in-kernel).
    x_flat = jnp.transpose(x_nchw, (0, 2, 3, 1)).reshape(P, Cin).astype(wd.dtype)
    if pad_rows:
        x_flat = jnp.pad(x_flat, ((0, pad_rows), (0, 0)))

    grid = (Pp // tile_p,)
    full = lambda i: (0, 0)  # whole (small) parameter tensors, resident every step

    out_flat = pl.pallas_call(
        _predictor_kernel,
        out_shape=jax.ShapeDtypeStruct((Pp, KK * Cpad), jnp.float32),
        grid_spec=pltpu.PrefetchScalarGridSpec(
            num_scalar_prefetch=0,
            grid=grid,
            in_specs=[
                pl.BlockSpec((tile_p, Cin), lambda i: (i, 0)),
                pl.BlockSpec((Cin, KK * Cout), full),
                pl.BlockSpec((1, KK * Cout), full),
                pl.BlockSpec((KK * Cout, KK * Cpad), full),
                pl.BlockSpec((1, KK * Cpad), full),
            ],
            out_specs=pl.BlockSpec((tile_p, KK * Cpad), lambda i: (i, 0)),
        ),
        compiler_params=pltpu.CompilerParams(
            dimension_semantics=("parallel",),
            vmem_limit_bytes=32 * 1024 * 1024),  # safe on v5e/v6e/v7x for these tiles
    )(x_flat, wd, bd, wf, bf)

    # ---- unpack: (pixels, kh*kw*Cpad) -> NCHW with 2x upsampled spatial.
    # Single transpose: (N,H,kh,W,kw,class) -> (N,class,H,kh,W,kw) -> (N,class,2H,2W)
    y = out_flat[:P].reshape(N, H, W, 2, 2, Cpad)[..., :Call]     # (N,H,W,kh,kw,C)
    y = jnp.transpose(y, (0, 5, 1, 3, 2, 4)).reshape(N, Call, 2 * H, 2 * W)
    return y[:, :1], y[:, 1:]                                     # mask, char logits


# ----------------------------------------------------------------------------
# Deterministic parameter init (kaiming_normal fan_out, zero bias), per module.
# ----------------------------------------------------------------------------
def init_params(key, num_inputs, dim_reduced, char_num_classes):
    k1, k2, k3 = jax.random.split(key, 3)

    def kaiming(k, shape):
        # PyTorch fan_out = shape[0] * prod(kernel dims), gain=sqrt(2) for relu.
        rf = 1
        for d in shape[2:]:
            rf *= d
        fan_out = shape[0] * rf
        std = (2.0 / fan_out) ** 0.5
        return std * jax.random.normal(k, shape, dtype=jnp.float32)

    return {
        # ConvTranspose2d(num_inputs, dim_reduced, 2, 2, 0): weight (in, out, 2, 2)
        "deconv_w": kaiming(k1, (num_inputs, dim_reduced, 2, 2)),
        "deconv_b": jnp.zeros((dim_reduced,), jnp.float32),
        # Conv2d(dim_reduced, 1, 1, 1, 0): weight (1, dim_reduced, 1, 1)
        "mask_w": kaiming(k2, (1, dim_reduced, 1, 1)),
        "mask_b": jnp.zeros((1,), jnp.float32),
        # Conv2d(dim_reduced, char_num_classes, 1, 1, 0)
        "char_w": kaiming(k3, (char_num_classes, dim_reduced, 1, 1)),
        "char_b": jnp.zeros((char_num_classes,), jnp.float32),
    }


# ----------------------------------------------------------------------------
# Pure-JAX f32 reference (independent path) for correctness checking.
# ----------------------------------------------------------------------------
def reference_forward(x, p):
    N, Cin, H, W = x.shape
    Cout = p["deconv_w"].shape[1]
    Cchar = p["char_w"].shape[0]
    y = jnp.einsum("nihw,iokl->nohkwl", x, p["deconv_w"])
    y = y.reshape(N, Cout, 2 * H, 2 * W) + p["deconv_b"][None, :, None, None]
    y = jnp.maximum(y, 0.0)
    m = (jnp.einsum("nchw,kc->nkhw", y, p["mask_w"].reshape(1, Cout))
         + p["mask_b"][None, :, None, None])
    c = (jnp.einsum("nchw,kc->nkhw", y, p["char_w"].reshape(Cchar, Cout))
         + p["char_b"][None, :, None, None])
    return m, c


if __name__ == "__main__":
    # Small config: USE_FPN with default MIX_OPTION -> num_inputs == dim_reduced.
    N, H, W = 2, 16, 16
    dim_reduced = 32
    num_inputs = dim_reduced
    char_num_classes = 37

    key = jax.random.PRNGKey(0)
    kx, kp = jax.random.split(key)
    x = jax.random.normal(kx, (N, num_inputs, H, W), dtype=jnp.float32)
    params = init_params(kp, num_inputs, dim_reduced, char_num_classes)

    packed = pack_params(params)  # packed once; params change rarely
    mask_logits, char_logits = char_mask_rcnn_c4_predictor(
        x, packed, num_char_classes=char_num_classes)
    jax.block_until_ready((mask_logits, char_logits))

    assert mask_logits.shape == (N, 1, 2 * H, 2 * W)
    assert char_logits.shape == (N, char_num_classes, 2 * H, 2 * W)

    # Check against the f32 reference; bf16 inputs/weights with f32 accumulation
    # give ~1e-2-level relative deltas.
    m_ref, c_ref = reference_forward(x, params)
    assert jnp.allclose(mask_logits, m_ref, atol=5e-2, rtol=5e-2)
    assert jnp.allclose(char_logits, c_ref, atol=5e-2, rtol=5e-2)

    print("KERNEL_OK")
</pallas_src>

<mosaic_0001>
module attributes {stable_mosaic.version = 11 : i64} {
  func.func @_predictor_kernel(%arg0: i32, %arg1: memref<256x32xbf16, #tpu.memory_space<vmem>>, %arg2: memref<32x128xbf16, #tpu.memory_space<vmem>>, %arg3: memref<1x128xf32, #tpu.memory_space<vmem>>, %arg4: memref<128x256xbf16, #tpu.memory_space<vmem>>, %arg5: memref<1x256xf32, #tpu.memory_space<vmem>>, %arg6: memref<256x256xf32, #tpu.memory_space<vmem>>) attributes {dimension_semantics = [#tpu.dimension_semantics<parallel>], iteration_bounds = array<i64: 2>, scalar_prefetch = 0 : i64, scratch_operands = 0 : i64, tpu.core_type = #tpu.core_type<tc>, window_params = [{transform_indices = @transform_0, window_bounds = array<i64: 256, 32>}, {pipeline_mode = #tpu.pipeline_mode<synchronous>, transform_indices = @transform_1, window_bounds = array<i64: 32, 128>}, {pipeline_mode = #tpu.pipeline_mode<synchronous>, transform_indices = @transform_2, window_bounds = array<i64: 1, 128>}, {pipeline_mode = #tpu.pipeline_mode<synchronous>, transform_indices = @transform_3, window_bounds = array<i64: 128, 256>}, {pipeline_mode = #tpu.pipeline_mode<synchronous>, transform_indices = @transform_4, window_bounds = array<i64: 1, 256>}, {transform_indices = @transform_5, window_bounds = array<i64: 256, 256>}]} {
    %c0 = arith.constant 0 : index
    %c0_0 = arith.constant 0 : index
    %0 = vector.load %arg1[%c0, %c0_0] : memref<256x32xbf16, #tpu.memory_space<vmem>>, vector<256x32xbf16>
    %c0_1 = arith.constant 0 : index
    %c0_2 = arith.constant 0 : index
    %1 = vector.load %arg2[%c0_1, %c0_2] : memref<32x128xbf16, #tpu.memory_space<vmem>>, vector<32x128xbf16>
    %cst = arith.constant dense<0.000000e+00> : vector<256x128xf32>
    %2 = tpu.matmul %0, %1, %cst {dimension_numbers = #tpu.dot_dimension_numbers<[1], [0], [0], [1], [0, 0, 1, 1], [], []>} : vector<256x32xbf16>, vector<32x128xbf16>, vector<256x128xf32> -> vector<256x128xf32>
    %c0_3 = arith.constant 0 : index
    %c0_4 = arith.constant 0 : index
    %3 = vector.load %arg3[%c0_3, %c0_4] : memref<1x128xf32, #tpu.memory_space<vmem>>, vector<1x128xf32>
    %4 = vector.broadcast %3 : vector<1x128xf32> to vector<256x128xf32>
    %5 = arith.addf %2, %4 : vector<256x128xf32>
    %cst_5 = arith.constant 0.000000e+00 : f32
    %6 = vector.broadcast %cst_5 : f32 to vector<256x128xf32>
    %7 = arith.maximumf %5, %6 : vector<256x128xf32>
    %8 = arith.truncf %7 : vector<256x128xf32> to vector<256x128xbf16>
    %c0_6 = arith.constant 0 : index
    %c0_7 = arith.constant 0 : index
    %9 = vector.load %arg4[%c0_6, %c0_7] : memref<128x256xbf16, #tpu.memory_space<vmem>>, vector<128x256xbf16>
    %cst_8 = arith.constant dense<0.000000e+00> : vector<256x256xf32>
    %10 = tpu.matmul %8, %9, %cst_8 {dimension_numbers = #tpu.dot_dimension_numbers<[1], [0], [0], [1], [0, 0, 1, 1], [], []>} : vector<256x128xbf16>, vector<128x256xbf16>, vector<256x256xf32> -> vector<256x256xf32>
    %c0_9 = arith.constant 0 : index
    %c0_10 = arith.constant 0 : index
    %11 = vector.load %arg5[%c0_9, %c0_10] : memref<1x256xf32, #tpu.memory_space<vmem>>, vector<1x256xf32>
    %12 = vector.broadcast %11 : vector<1x256xf32> to vector<256x256xf32>
    %13 = arith.addf %10, %12 : vector<256x256xf32>
    %c0_11 = arith.constant 0 : index
    %c0_12 = arith.constant 0 : index
    %14 = vector.load %arg6[%c0_11, %c0_12] : memref<256x256xf32, #tpu.memory_space<vmem>>, vector<256x256xf32>
    tpu.vector_store %arg6[%c0_11, %c0_12], %13 {strides = array<i32>} : memref<256x256xf32, #tpu.memory_space<vmem>>, vector<256x256xf32>,
    return
  }
  func.func @transform_0(%arg0: i32) -> (i32, i32) {
    %c0_i32 = arith.constant 0 : i32
    %c0_i32_0 = arith.constant 0 : i32
    return %arg0, %c0_i32 : i32, i32
  }
  func.func @transform_1(%arg0: i32) -> (i32, i32) {
    %c0_i32 = arith.constant 0 : i32
    %c0_i32_0 = arith.constant 0 : i32
    %c0_i32_1 = arith.constant 0 : i32
    return %c0_i32, %c0_i32_0 : i32, i32
  }
  func.func @transform_2(%arg0: i32) -> (i32, i32) {
    %c0_i32 = arith.constant 0 : i32
    %c0_i32_0 = arith.constant 0 : i32
    %c0_i32_1 = arith.constant 0 : i32
    return %c0_i32, %c0_i32_0 : i32, i32
  }
  func.func @transform_3(%arg0: i32) -> (i32, i32) {
    %c0_i32 = arith.constant 0 : i32
    %c0_i32_0 = arith.constant 0 : i32
    %c0_i32_1 = arith.constant 0 : i32
    return %c0_i32, %c0_i32_0 : i32, i32
  }
  func.func @transform_4(%arg0: i32) -> (i32, i32) {
    %c0_i32 = arith.constant 0 : i32
    %c0_i32_0 = arith.constant 0 : i32
    %c0_i32_1 = arith.constant 0 : i32
    return %c0_i32, %c0_i32_0 : i32, i32
  }
  func.func @transform_5(%arg0: i32) -> (i32, i32) {
    %c0_i32 = arith.constant 0 : i32
    %c0_i32_0 = arith.constant 0 : i32
    return %arg0, %c0_i32 : i32, i32
  }
}

</mosaic_0001>

<bundles_post_ra>
// kernel: char_mask_rcnn_c4_predictor.1
= control target key start
LH: loop header
LB: loop body
LE: loop exit
PB: predicated region body
PF: predicated region fallthrough
CT: control target
= control target key end

     0   :  { %s1271_s18 = smov 0   ;;  %s1570_s0 = inlined_call_operand.vmem [shape: bf16[512,32], index: 0, kind: input, shape index: {}]   ;;  %s1571_s1 = inlined_call_operand.vmem [shape: bf16[32,128], index: 1, kind: input, shape index: {}]   ;;  %s1572_s2 = inlined_call_operand.vmem [shape: f32[1,128], index: 2, kind: input, shape index: {}]   ;;  %s1573_s3 = inlined_call_operand.vmem [shape: bf16[128,256], index: 3, kind: input, shape index: {}]   ;;  %s1574_s4 = inlined_call_operand.vmem [shape: f32[1,256], index: 4, kind: input, shape index: {}]   ;;  %s1575_s5 = inlined_call_operand.vmem [shape: f32[512,256], index: 5, kind: output, shape index: {}]  }
   0x1 LB: > { %s1047_s19 = sadd.s32 4294967295, %s1238_s18   ;;  %p1051_p0 = scmp.ge.s32.totalorder %s1238_s18, 1  ;;  %s1238_s18 = sphi %s1271_s18, %s15_s18  }
   0x2   : > { %p188_p1 = scmp.lt.s32.totalorder %s1238_s18, 3 }
   0x4   : > { %p189_p2 = pnand %p1051_p0, %p188_p1 }
   0x5   : > { %s1052_s22 = sshll.u32 (!%p189_p2), %s1047_s19, 5 }
   0x6   : > { %192 = sbr.rel (%p189_p2) target bundleno = 523 (0x20b), region = 40  ;;  %p218_p3 = scmp.lt.s32.totalorder (!%p189_p2), %s1052_s22, 63 }
   0xb   : > { %v1190_v0 = vld [vmem:[%s1571_s1 + $0x8] sm:$0xff]   ;;  %v1191_v1 = vld [vmem:[%s1571_s1] sm:$0xff]   ;;  %s1577_s22 = smov (!%p218_p3, %s1052_s22), 63  ;;  %v1210_v2 = vld [vmem:[%s1573_s3 + $0x74] ss:$8 sps:$4 sm:$0xff]   ;;  %vm366_vm0 = vcmask 261120  }
   0xc   : > { %1129 = vmatprep.subr.bf16.mxu0 %v1190_v0  ;;  %v1208_v3 = vld [vmem:[%s1573_s3 + $0x70] ss:$8 sps:$4 sm:$0xff]   ;;  %s1053_s29 = sshll.u32 %s1577_s22, 2  ;;  %v1213_v4 = vld [vmem:[%s1573_s3 + $0x64] ss:$8 sps:$4 sm:$0xff]   ;;  %1165 = vmatprep.subr.bf16.mxu1 %v1210_v2  ;;  %v1240_v34 = vmov 0  }
   0xd   : > { %1130 = vmatpush3.bf16.msra.mxu0 %v1190_v0  ;;  %s1300_s9 = scalar_lea.vmem %s1570_s0, %s1053_s29  ;;  %v1211_v5 = vld [vmem:[%s1573_s3 + $0x60] ss:$8 sps:$4 sm:$0xff]   ;;  %1173 = vmatpush1.bf16.msra.mxu1 %v1208_v3  ;;  %v1216_v9 = vld [vmem:[%s1573_s3 + $0x54] ss:$8 sps:$4 sm:$0xff]   ;;  %v1214_v10 = vld [vmem:[%s1573_s3 + $0x50] ss:$8 sps:$4 sm:$0xff]  }
   0xe   : > { %1131 = vmatprep.subr.bf16.mxu0 %v1191_v1  ;;  %v1192_v6 = vld [vmem:[%s1300_s9] sm:$0xff]   ;;  %1166 = vmatprep.subr.bf16.mxu1 %v1213_v4  ;;  %v1193_v7 = vld [vmem:[%s1300_s9 + $0x8] sm:$0xff]   ;;  %v1194_v8 = vld [vmem:[%s1300_s9 + $0x10] sm:$0xff]   ;;  %s1110_s17 = sshll.u32 %s1577_s22, 4 }
   0xf   : > { %1133 = vmatprep.mubr.msk.bf16.mxu0 %vm366_vm0, %v1192_v6  ;;  %v1195_v11 = vld [vmem:[%s1300_s9 + $0x18] sm:$0xff]   ;;  %v1196_v12 = vld [vmem:[%s1300_s9 + $0x20] sm:$0xff]   ;;  %v1197_v13 = vld [vmem:[%s1300_s9 + $0x28] sm:$0xff]   ;;  %814 = vmatprep.mubr.bf16.mxu1 %v1240_v34  ;;  %s1437_s21 = scalar_lea.vmem %s1575_s5, %s1110_s17 }
  0x10   : > { %v1217_v14 = vld [vmem:[%s1573_s3 + $0x40] ss:$8 sps:$4 sm:$0xff]   ;;  %v1198_v15 = vld [vmem:[%s1300_s9 + $0x30] sm:$0xff]   ;;  %v1219_v16 = vld [vmem:[%s1573_s3 + $0x44] ss:$8 sps:$4 sm:$0xff]  }
  0x11   : > { %1132 = vmatpush3.bf16.msra.mxu0 %v1191_v1  ;;  %1174 = vmatpush1.bf16.msra.mxu1 %v1211_v5  ;;  %v1222_v17 = vld [vmem:[%s1573_s3 + $0x34] ss:$8 sps:$4 sm:$0xff]   ;;  %v1220_v18 = vld [vmem:[%s1573_s3 + $0x30] ss:$8 sps:$4 sm:$0xff]   ;;  %v1200_v20 = vld [vmem:[%s1300_s9 + $0x40] sm:$0xff]  }
  0x12   : > { %732 = vmatprep.subr.bf16.mxu0 %v1210_v2  ;;  %1167 = vmatprep.subr.bf16.mxu1 %v1216_v9  ;;  %v1199_v19 = vld [vmem:[%s1300_s9 + $0x38] sm:$0xff]   ;;  %v1201_v21 = vld [vmem:[%s1300_s9 + $0x48] sm:$0xff]   ;;  %v1202_v22 = vld [vmem:[%s1300_s9 + $0x50] sm:$0xff]  }
  0x13   : > { %v1203_v23 = vld [vmem:[%s1300_s9 + $0x58] sm:$0xff]   ;;  %v1204_v24 = vld [vmem:[%s1300_s9 + $0x60] sm:$0xff]   ;;  %v1205_v25 = vld [vmem:[%s1300_s9 + $0x68] sm:$0xff]  }
  0x14   : > { %1134 = vmatmul.mubr.msk.bf16.vlgmr.msra.gmra.mxu0 %vm366_vm0, %v1193_v7  ;;  %v1206_v26 = vld [vmem:[%s1300_s9 + $0x70] sm:$0xff]   ;;  %v1207_v27 = vld [vmem:[%s1300_s9 + $0x78] sm:$0xff]   ;;  %v1225_v28 = vld [vmem:[%s1573_s3 + $0x24] ss:$8 sps:$4 sm:$0xff]  }
  0x15   : > { %1137 = vmatprep.mubr.msk.bf16.mxu0 %vm366_vm0, %v1194_v8  ;;  %733 = vmatpush1.bf16.msra.mxu0 %v1208_v3  ;;  %v1223_v29 = vld [vmem:[%s1573_s3 + $0x20] ss:$8 sps:$4 sm:$0xff]   ;;  %v1228_v30 = vld [vmem:[%s1573_s3 + $0x14] ss:$8 sps:$4 sm:$0xff]   ;;  %v1226_v31 = vld [vmem:[%s1573_s3 + $0x10] ss:$8 sps:$4 sm:$0xff]  }
  0x16   : > { %734 = vmatprep.subr.bf16.mxu0 %v1213_v4  ;;  %1175 = vmatpush1.bf16.msra.mxu1 %v1214_v10  ;;  %v1231_v32 = vld [vmem:[%s1573_s3 + $0x4] ss:$8 sps:$4 sm:$0xff]   ;;  %v1229_v33 = vld [vmem:[%s1573_s3] ss:$8 sps:$4 sm:$0xff]  }
  0x17   : > { %1168 = vmatprep.subr.bf16.mxu1 %v1219_v16  ;;  %v1378_v37 = vld [vmem:[%s1572_s2] ss:$0 sm:$0xff] }
  0x19   : > { %735 = vmatpush1.bf16.msra.mxu0 %v1211_v5 }
  0x1a   : > { %736 = vmatprep.subr.bf16.mxu0 %v1216_v9  ;;  %1176 = vmatpush1.bf16.msra.mxu1 %v1217_v14 }
  0x1b   : > { %1169 = vmatprep.subr.bf16.mxu1 %v1222_v17 }
  0x1c   : > { %1138 = vmatmul.mubr.msk.bf16.gmra.mxu0 %vm366_vm0, %v1195_v11 }
  0x1d   : > { %1141 = vmatprep.mubr.msk.bf16.mxu0 %vm366_vm0, %v1196_v12  ;;  %737 = vmatpush1.bf16.msra.mxu0 %v1214_v10 }
  0x1e   : > { %738 = vmatprep.subr.bf16.mxu0 %v1219_v16  ;;  %1177 = vmatpush1.bf16.msra.mxu1 %v1220_v18 }
  0x1f   : > { %1170 = vmatprep.subr.bf16.mxu1 %v1225_v28 }
  0x21   : > { %739 = vmatpush1.bf16.msra.mxu0 %v1217_v14 }
  0x22   : > { %740 = vmatprep.subr.bf16.mxu0 %v1222_v17  ;;  %1178 = vmatpush1.bf16.msra.mxu1 %v1223_v29 }
  0x23   : > { %1171 = vmatprep.subr.bf16.mxu1 %v1228_v30 }
  0x24   : > { %1142 = vmatmul.mubr.msk.bf16.gmra.mxu0 %vm366_vm0, %v1197_v13 }
  0x25   : > { %1145 = vmatprep.mubr.msk.bf16.mxu0 %vm366_vm0, %v1198_v15  ;;  %741 = vmatpush1.bf16.msra.mxu0 %v1220_v18 }
  0x26   : > { %742 = vmatprep.subr.bf16.mxu0 %v1225_v28  ;;  %1179 = vmatpush1.bf16.msra.mxu1 %v1226_v31 }
  0x27   : > { %1172 = vmatprep.subr.bf16.mxu1 %v1231_v32 }
  0x29   : > { %743 = vmatpush1.bf16.msra.mxu0 %v1223_v29 }
  0x2a   : > { %744 = vmatprep.subr.bf16.mxu0 %v1228_v30  ;;  %1180 = vmatpush1.bf16.msra.mxu1 %v1229_v33 }
  0x2c   : > { %1146 = vmatmul.mubr.msk.bf16.gmra.mxu0 %vm366_vm0, %v1199_v19 }
  0x2d   : > { %1149 = vmatprep.mubr.msk.bf16.mxu0 %vm366_vm0, %v1200_v20  ;;  %745 = vmatpush1.bf16.msra.mxu0 %v1226_v31 }
  0x2e   : > { %746 = vmatprep.subr.bf16.mxu0 %v1231_v32 }
  0x31   : > { %747 = vmatpush1.bf16.msra.mxu0 %v1229_v33 }
  0x34   : > { %1150 = vmatmul.mubr.msk.bf16.gmra.mxu0 %vm366_vm0, %v1201_v21 }
  0x35   : > { %1153 = vmatprep.mubr.msk.bf16.mxu0 %vm366_vm0, %v1202_v22 }
  0x3c   : > { %1154 = vmatmul.mubr.msk.bf16.gmra.mxu0 %vm366_vm0, %v1203_v23 }
  0x3d   : > { %1157 = vmatprep.mubr.msk.bf16.mxu0 %vm366_vm0, %v1204_v24 }
  0x44   : > { %1158 = vmatmul.mubr.msk.bf16.gmra.mxu0 %vm366_vm0, %v1205_v25 }
  0x45   : > { %1161 = vmatprep.mubr.msk.bf16.mxu0 %vm366_vm0, %v1206_v26 }
  0x4c   : > { %1162 = vmatmul.mubr.msk.bf16.gmra.mxu0 %vm366_vm0, %v1207_v27 }
  0x4d   : > { %764 = vmatprep.mubr.bf16.mxu0 %v1240_v34 }
  0xd4   : > { %v1135_v35 = vpop.f32.mrf.mxu0 }
  0xd5   : > { %v458_v49 = vadd.f32 %v1135_v35, %v1378_v37 }
  0xd6   : > { %v449_v36 = vpop.f32.mrf.mxu0 }
  0xd7   : > { %v450_v39 = vadd.f32 %v1378_v37, %v449_v36  ;;  %v578_v53 = vmax.f32 %v458_v49, 0.0 }
  0xd8   : > { %v1136_v38 = vpop.f32.mrf.mxu0 }
  0xd9   : > { %v576_v43 = vmax.f32 %v450_v39, 0.0  ;;  %v461_v46 = vadd.f32 %v1136_v38, %v1378_v37 }
  0xda   : > { %v452_v40 = vpop.f32.mrf.mxu0 }
  0xdb   : > { %v453_v41 = vadd.f32 %v1378_v37, %v452_v40  ;;  %v579_v51 = vmax.f32 %v461_v46, 0.0 }
  0xdc   : > { %v1139_v42 = vpop.f32.mrf.mxu0 }
  0xdd   : > { %v577_v44 = vmax.f32 %v453_v41, 0.0  ;;  %v609_v55 = vpack.c.bf16 %v579_v51, %v578_v53  ;;  %v474_v8 = vadd.f32 %v1139_v42, %v1378_v37 }
  0xde   : > { %v465_v45 = vpop.f32.mrf.mxu0 }
  0xdf   : > { %v608_v47 = vpack.c.bf16 %v577_v44, %v576_v43  ;;  %v466_v59 = vadd.f32 %v1378_v37, %v465_v45  ;;  %v582_v14 = vmax.f32 %v474_v8, 0.0 }
  0xe0   : > { %v1140_v48 = vpop.f32.mrf.mxu0 }
  0xe1   : > { %765 = vmatmul.mubr.bf16.vlgmr.msra.gmra.mxu0 %v608_v47  ;;  %v580_v2 = vmax.f32 %v466_v59, 0.0  ;;  %v477_v5 = vadd.f32 %v1140_v48, %v1378_v37 }
  0xe2   : > { %v468_v50 = vpop.f32.mrf.mxu0  ;;  %774 = vmatprep.mubr.bf16.mxu0 %v1240_v34 }
  0xe3   : > { %v469_v56 = vadd.f32 %v1378_v37, %v468_v50  ;;  %v583_v11 = vmax.f32 %v477_v5, 0.0 }
  0xe4   : > { %v1143_v52 = vpop.f32.mrf.mxu0 }
  0xe5   : > { %v490_v57 = vadd.f32 %v1143_v52, %v1378_v37  ;;  %v581_v62 = vmax.f32 %v469_v56, 0.0  ;;  %v611_v18 = vpack.c.bf16 %v583_v11, %v582_v14 }
  0xe6   : > { %v481_v54 = vpop.f32.mrf.mxu0 }
  0xe7   : > { %v586_v63 = vmax.f32 %v490_v57, 0.0  ;;  %v610_v6 = vpack.c.bf16 %v581_v62, %v580_v2  ;;  %v482_v23 = vadd.f32 %v1378_v37, %v481_v54 }
  0xe8   : > { %v1144_v58 = vpop.f32.mrf.mxu0 }
  0xe9   : > { %v493_v60 = vadd.f32 %v1144_v58, %v1378_v37  ;;  %775 = vmatmul.mubr.bf16.gmra.mxu0 %v609_v55  ;;  %v584_v28 = vmax.f32 %v482_v23, 0.0 }
  0xea   : > { %v484_v61 = vpop.f32.mrf.mxu0  ;;  %784 = vmatprep.mubr.bf16.mxu0 %v1240_v34 }
  0xeb   : > { %v587_v0 = vmax.f32 %v493_v60, 0.0  ;;  %v485_v19 = vadd.f32 %v1378_v37, %v484_v61 }
  0xec   : > { %v1147_v1 = vpop.f32.mrf.mxu0 }
  0xed   : > { %v613_v3 = vpack.c.bf16 %v587_v0, %v586_v63  ;;  %v506_v24 = vadd.f32 %v1147_v1, %v1378_v37  ;;  %v585_v25 = vmax.f32 %v485_v19, 0.0 }
  0xee   : > { %v497_v4 = vpop.f32.mrf.mxu0 }
  0xef   : > { %815 = vmatmul.mubr.bf16.vlgmr.msra.gmra.mxu1 %v613_v3  ;;  %v498_v9 = vadd.f32 %v1378_v37, %v497_v4  ;;  %v590_v29 = vmax.f32 %v506_v24, 0.0  ;;  %v612_v30 = vpack.c.bf16 %v585_v25, %v584_v28  ;;  %v640_v25 = vld [vmem:[%s1574_s4] sm:$0x3] }
  0xf0   : > { %v1148_v7 = vpop.f32.mrf.mxu0  ;;  %824 = vmatprep.mubr.bf16.mxu1 %v1240_v34 }
  0xf1   : > { %785 = vmatmul.mubr.bf16.gmra.mxu0 %v610_v6  ;;  %v588_v15 = vmax.f32 %v498_v9, 0.0  ;;  %v509_v20 = vadd.f32 %v1148_v7, %v1378_v37 }
  0xf2   : > { %v500_v10 = vpop.f32.mrf.mxu0  ;;  %794 = vmatprep.mubr.bf16.mxu0 %v1240_v34 }
  0xf3   : > { %v501_v12 = vadd.f32 %v1378_v37, %v500_v10  ;;  %v591_v26 = vmax.f32 %v509_v20, 0.0 }
  0xf4   : > { %v1151_v13 = vpop.f32.mrf.mxu0 }
  0xf5   : > { %v589_v16 = vmax.f32 %v501_v12, 0.0  ;;  %v615_v31 = vpack.c.bf16 %v591_v26, %v590_v29  ;;  %v522_v40 = vadd.f32 %v1151_v13, %v1378_v37 }
  0xf6   : > { %v513_v17 = vpop.f32.mrf.mxu0 }
  0xf7   : > { %v614_v21 = vpack.c.bf16 %v589_v16, %v588_v15  ;;  %v514_v32 = vadd.f32 %v1378_v37, %v513_v17  ;;  %v594_v44 = vmax.f32 %v522_v40, 0.0 }
  0xf8   : > { %v1152_v22 = vpop.f32.mrf.mxu0 }
  0xf9   : > { %795 = vmatmul.mubr.bf16.gmra.mxu0 %v611_v18  ;;  %825 = vmatmul.mubr.bf16.gmra.mxu1 %v614_v21  ;;  %v592_v36 = vmax.f32 %v514_v32, 0.0  ;;  %v525_v41 = vadd.f32 %v1152_v22, %v1378_v37  ;;  %v642_v22 = vlaneseq }
  0xfa   : > { %804 = vmatprep.mubr.bf16.mxu0 %v1240_v34  ;;  %834 = vmatprep.mubr.bf16.mxu1 %v1240_v34  ;;  %v516_v27 = vpop.f32.mrf.mxu0 }
  0xfb   : > { %v517_v33 = vadd.f32 %v1378_v37, %v516_v27  ;;  %v595_v45 = vmax.f32 %v525_v41, 0.0  ;;  %v643_v23 = vshrl.u32 %v642_v22, 7 }
  0xfc   : > { %v1155_v35 = vpop.f32.mrf.mxu0 }
  0xfd   : > { %v593_v38 = vmax.f32 %v517_v33, 0.0  ;;  %v617_v47 = vpack.c.bf16 %v595_v45, %v594_v44  ;;  %v538_v54 = vadd.f32 %v1155_v35, %v1378_v37  ;;  %v644_v24 = vsub.s32 0, %v643_v23 }
  0xfe   : > { %v529_v39 = vpop.f32.mrf.mxu0  ;;  %v648_v26 = vsub.s32 1, %v643_v23 }
  0xff   : > { %v616_v42 = vpack.c.bf16 %v593_v38, %v592_v36  ;;  %v530_v48 = vadd.f32 %v1378_v37, %v529_v39  ;;  %v598_v58 = vmax.f32 %v538_v54, 0.0  ;;  %v1430_v27 = vrot.slane %v640_v25, %v644_v24 }
 0x100   : > { %v1156_v43 = vpop.f32.mrf.mxu0 }
 0x101   : > { %805 = vmatmul.mubr.bf16.gmra.mxu0 %v612_v30  ;;  %835 = vmatmul.mubr.bf16.gmra.mxu1 %v615_v31  ;;  %v596_v51 = vmax.f32 %v530_v48, 0.0  ;;  %v541_v55 = vadd.f32 %v1156_v43, %v1378_v37 }
 0x102   : > { %844 = vmatprep.mubr.bf16.mxu1 %v1240_v34  ;;  %v532_v46 = vpop.f32.mrf.mxu0 }
 0x103   : > { %v533_v49 = vadd.f32 %v1378_v37, %v532_v46  ;;  %v599_v59 = vmax.f32 %v541_v55, 0.0 }
 0x104   : > { %v1159_v50 = vpop.f32.mrf.mxu0 }
 0x105   : > { %v597_v52 = vmax.f32 %v533_v49, 0.0  ;;  %v619_v61 = vpack.c.bf16 %v599_v59, %v598_v58  ;;  %v554_v4 = vadd.f32 %v1159_v50, %v1378_v37 }
 0x106   : > { %v545_v53 = vpop.f32.mrf.mxu0 }
 0x107   : > { %v618_v56 = vpack.c.bf16 %v597_v52, %v596_v51  ;;  %v546_v62 = vadd.f32 %v1378_v37, %v545_v53  ;;  %v602_v8 = vmax.f32 %v554_v4, 0.0 }
 0x108   : > { %v1160_v57 = vpop.f32.mrf.mxu0 }
 0x109   : > { %845 = vmatmul.mubr.bf16.gmra.mxu1 %v616_v42  ;;  %v600_v1 = vmax.f32 %v546_v62, 0.0  ;;  %v557_v5 = vadd.f32 %v1160_v57, %v1378_v37 }
 0x10a   : > { %854 = vmatprep.mubr.bf16.mxu1 %v1240_v34  ;;  %v548_v60 = vpop.f32.mrf.mxu0 }
 0x10b   : > { %v549_v63 = vadd.f32 %v1378_v37, %v548_v60  ;;  %v603_v9 = vmax.f32 %v557_v5, 0.0 }
 0x10c   : > { %v1163_v0 = vpop.f32.mrf.mxu0 }
 0x10d   : > { %v601_v2 = vmax.f32 %v549_v63, 0.0  ;;  %v621_v11 = vpack.c.bf16 %v603_v9, %v602_v8  ;;  %v570_v16 = vadd.f32 %v1163_v0, %v1378_v37 }
 0x10e   : > { %v561_v3 = vpop.f32.mrf.mxu0 }
 0x10f   : > { %v620_v6 = vpack.c.bf16 %v601_v2, %v600_v1  ;;  %v562_v12 = vadd.f32 %v1378_v37, %v561_v3  ;;  %v606_v19 = vmax.f32 %v570_v16, 0.0 }
 0x110   : > { %v1164_v7 = vpop.f32.mrf.mxu0 }
 0x111   : > { %855 = vmatmul.mubr.bf16.gmra.mxu1 %v617_v47  ;;  %v604_v14 = vmax.f32 %v562_v12, 0.0  ;;  %v573_v17 = vadd.f32 %v1164_v7, %v1378_v37 }
 0x112   : > { %864 = vmatprep.mubr.bf16.mxu1 %v1240_v34  ;;  %v564_v10 = vpop.f32.mrf.mxu0 }
 0x113   : > { %v565_v13 = vadd.f32 %v1378_v37, %v564_v10  ;;  %v607_v20 = vmax.f32 %v573_v17, 0.0  ;;  %v1432_v37 = vrot.slane %v640_v25, %v648_v26 }
 0x115   : > { %v605_v15 = vmax.f32 %v565_v13, 0.0  ;;  %v623_v21 = vpack.c.bf16 %v607_v20, %v606_v19 }
 0x117   : > { %v622_v18 = vpack.c.bf16 %v605_v15, %v604_v14 }
 0x119   : > { %865 = vmatmul.mubr.bf16.gmra.mxu1 %v618_v56 }
 0x11a   : > { %874 = vmatprep.mubr.bf16.mxu1 %v1240_v34 }
 0x121   : > { %875 = vmatmul.mubr.bf16.gmra.mxu1 %v619_v61 }
 0x122   : > { %884 = vmatprep.mubr.bf16.mxu1 %v1240_v34 }
 0x129   : > { %885 = vmatmul.mubr.bf16.gmra.mxu1 %v620_v6 }
 0x12a   : > { %894 = vmatprep.mubr.bf16.mxu1 %v1240_v34 }
 0x131   : > { %895 = vmatmul.mubr.bf16.gmra.mxu1 %v621_v11 }
 0x132   : > { %904 = vmatprep.mubr.bf16.mxu1 %v1240_v34 }
 0x139   : > { %905 = vmatmul.mubr.bf16.gmra.mxu1 %v622_v18 }
 0x13a   : > { %914 = vmatprep.mubr.bf16.mxu1 %v1240_v34 }
 0x141   : > { %915 = vmatmul.mubr.bf16.gmra.mxu1 %v623_v21 }
 0x1a1   : > { %v766_v34 = vpop.f32.mrf.mxu0 }
 0x1a2   : > { %v767_v28 = vadd.f32 %v766_v34, %v1430_v27 }
 0x1a3   : > { %v768_v29 = vpop.f32.mrf.mxu0 }
 0x1a4   : > { %925 = vst [vmem:[%s1437_s21] sm:$0xff] %v767_v28  ;;  %v769_v30 = vadd.f32 %v768_v29, %v1432_v37 }
 0x1a5   : > { %v770_v31 = vpop.f32.mrf.mxu0 }
 0x1a6   : > { %926 = vst [vmem:[%s1437_s21 + $0x8] sm:$0xff] %v769_v30  ;;  %v771_v32 = vadd.f32 %v770_v31, %v1430_v27 }
 0x1a7   : > { %v772_v33 = vpop.f32.mrf.mxu0 }
 0x1a8   : > { %927 = vst [vmem:[%s1437_s21 + $0x10] sm:$0xff] %v771_v32  ;;  %v773_v35 = vadd.f32 %v772_v33, %v1432_v37 }
 0x1a9   : > { %v776_v36 = vpop.f32.mrf.mxu0 }
 0x1aa   : > { %928 = vst [vmem:[%s1437_s21 + $0x18] sm:$0xff] %v773_v35  ;;  %v777_v38 = vadd.f32 %v776_v36, %v1430_v27 }
 0x1ab   : > { %v778_v39 = vpop.f32.mrf.mxu0 }
 0x1ac   : > { %929 = vst [vmem:[%s1437_s21 + $0x20] sm:$0xff] %v777_v38  ;;  %v779_v40 = vadd.f32 %v778_v39, %v1432_v37 }
 0x1ad   : > { %v780_v41 = vpop.f32.mrf.mxu0 }
 0x1ae   : > { %930 = vst [vmem:[%s1437_s21 + $0x28] sm:$0xff] %v779_v40  ;;  %v781_v42 = vadd.f32 %v780_v41, %v1430_v27 }
 0x1af   : > { %v782_v43 = vpop.f32.mrf.mxu0  ;;  %v816_v44 = vpop.f32.mrf.mxu1 }
 0x1b0   : > { %931 = vst [vmem:[%s1437_s21 + $0x30] sm:$0xff] %v781_v42  ;;  %v783_v45 = vadd.f32 %v782_v43, %v1432_v37  ;;  %v817_v46 = vadd.f32 %v816_v44, %v1430_v27 }
 0x1b1   : > { %v786_v47 = vpop.f32.mrf.mxu0  ;;  %v818_v48 = vpop.f32.mrf.mxu1 }
 0x1b2   : > { %932 = vst [vmem:[%s1437_s21 + $0x38] sm:$0xff] %v783_v45  ;;  %945 = vst [vmem:[%s1437_s21 + $0xa0] sm:$0xff] %v817_v46  ;;  %v787_v49 = vadd.f32 %v786_v47, %v1430_v27  ;;  %v819_v50 = vadd.f32 %v818_v48, %v1432_v37 }
 0x1b3   : > { %v788_v51 = vpop.f32.mrf.mxu0  ;;  %v820_v52 = vpop.f32.mrf.mxu1 }
 0x1b4   : > { %933 = vst [vmem:[%s1437_s21 + $0x40] sm:$0xff] %v787_v49  ;;  %946 = vst [vmem:[%s1437_s21 + $0xa8] sm:$0xff] %v819_v50  ;;  %v789_v53 = vadd.f32 %v788_v51, %v1432_v37  ;;  %v821_v54 = vadd.f32 %v820_v52, %v1430_v27 }
 0x1b5   : > { %v790_v55 = vpop.f32.mrf.mxu0  ;;  %v822_v56 = vpop.f32.mrf.mxu1 }
 0x1b6   : > { %934 = vst [vmem:[%s1437_s21 + $0x48] sm:$0xff] %v789_v53  ;;  %947 = vst [vmem:[%s1437_s21 + $0xb0] sm:$0xff] %v821_v54  ;;  %v791_v57 = vadd.f32 %v790_v55, %v1430_v27  ;;  %v823_v58 = vadd.f32 %v822_v56, %v1432_v37 }
 0x1b7   : > { %v792_v59 = vpop.f32.mrf.mxu0 }
 0x1b8   : > { %935 = vst [vmem:[%s1437_s21 + $0x50] sm:$0xff] %v791_v57  ;;  %948 = vst [vmem:[%s1437_s21 + $0xb8] sm:$0xff] %v823_v58  ;;  %v793_v60 = vadd.f32 %v792_v59, %v1432_v37 }
 0x1b9   : > { %v796_v61 = vpop.f32.mrf.mxu0  ;;  %v826_v62 = vpop.f32.mrf.mxu1 }
 0x1ba   : > { %936 = vst [vmem:[%s1437_s21 + $0x58] sm:$0xff] %v793_v60  ;;  %v797_v63 = vadd.f32 %v796_v61, %v1430_v27  ;;  %v827_v0 = vadd.f32 %v826_v62, %v1430_v27 }
 0x1bb   : > { %v798_v1 = vpop.f32.mrf.mxu0  ;;  %v828_v2 = vpop.f32.mrf.mxu1 }
 0x1bc   : > { %937 = vst [vmem:[%s1437_s21 + $0x60] sm:$0xff] %v797_v63  ;;  %949 = vst [vmem:[%s1437_s21 + $0xc0] sm:$0xff] %v827_v0  ;;  %v799_v3 = vadd.f32 %v798_v1, %v1432_v37  ;;  %v829_v4 = vadd.f32 %v828_v2, %v1432_v37 }
 0x1bd   : > { %v800_v5 = vpop.f32.mrf.mxu0  ;;  %v830_v6 = vpop.f32.mrf.mxu1 }
 0x1be   : > { %938 = vst [vmem:[%s1437_s21 + $0x68] sm:$0xff] %v799_v3  ;;  %950 = vst [vmem:[%s1437_s21 + $0xc8] sm:$0xff] %v829_v4  ;;  %v801_v7 = vadd.f32 %v800_v5, %v1430_v27  ;;  %v831_v8 = vadd.f32 %v830_v6, %v1430_v27 }
 0x1bf   : > { %v802_v9 = vpop.f32.mrf.mxu0  ;;  %v832_v10 = vpop.f32.mrf.mxu1 }
 0x1c0   : > { %939 = vst [vmem:[%s1437_s21 + $0x70] sm:$0xff] %v801_v7  ;;  %951 = vst [vmem:[%s1437_s21 + $0xd0] sm:$0xff] %v831_v8  ;;  %v803_v11 = vadd.f32 %v802_v9, %v1432_v37  ;;  %v833_v12 = vadd.f32 %v832_v10, %v1432_v37 }
 0x1c1   : > { %v806_v13 = vpop.f32.mrf.mxu0  ;;  %v836_v14 = vpop.f32.mrf.mxu1 }
 0x1c2   : > { %940 = vst [vmem:[%s1437_s21 + $0x78] sm:$0xff] %v803_v11  ;;  %952 = vst [vmem:[%s1437_s21 + $0xd8] sm:$0xff] %v833_v12  ;;  %v807_v15 = vadd.f32 %v806_v13, %v1430_v27  ;;  %v837_v16 = vadd.f32 %v836_v14, %v1430_v27 }
 0x1c3   : > { %v808_v17 = vpop.f32.mrf.mxu0  ;;  %v838_v18 = vpop.f32.mrf.mxu1 }
 0x1c4   : > { %941 = vst [vmem:[%s1437_s21 + $0x80] sm:$0xff] %v807_v15  ;;  %953 = vst [vmem:[%s1437_s21 + $0xe0] sm:$0xff] %v837_v16  ;;  %v809_v19 = vadd.f32 %v808_v17, %v1432_v37  ;;  %v839_v20 = vadd.f32 %v838_v18, %v1432_v37 }
 0x1c5   : > { %v810_v21 = vpop.f32.mrf.mxu0  ;;  %v840_v22 = vpop.f32.mrf.mxu1 }
 0x1c6   : > { %942 = vst [vmem:[%s1437_s21 + $0x88] sm:$0xff] %v809_v19  ;;  %954 = vst [vmem:[%s1437_s21 + $0xe8] sm:$0xff] %v839_v20  ;;  %v811_v23 = vadd.f32 %v810_v21, %v1430_v27  ;;  %v841_v24 = vadd.f32 %v840_v22, %v1430_v27 }
 0x1c7   : > { %v812_v25 = vpop.f32.mrf.mxu0  ;;  %v842_v26 = vpop.f32.mrf.mxu1 }
 0x1c8   : > { %943 = vst [vmem:[%s1437_s21 + $0x90] sm:$0xff] %v811_v23  ;;  %955 = vst [vmem:[%s1437_s21 + $0xf0] sm:$0xff] %v841_v24  ;;  %v813_v34 = vadd.f32 %v812_v25, %v1432_v37  ;;  %v843_v28 = vadd.f32 %v842_v26, %v1432_v37 }
 0x1c9   : > { %v846_v29 = vpop.f32.mrf.mxu1 }
 0x1ca   : > { %944 = vst [vmem:[%s1437_s21 + $0x98] sm:$0xff] %v813_v34  ;;  %956 = vst [vmem:[%s1437_s21 + $0xf8] sm:$0xff] %v843_v28  ;;  %v847_v30 = vadd.f32 %v846_v29, %v1430_v27 }
 0x1cb   : > { %v848_v31 = vpop.f32.mrf.mxu1 }
 0x1cc   : > { %957 = vst [vmem:[%s1437_s21 + $0x100] sm:$0xff] %v847_v30  ;;  %v849_v32 = vadd.f32 %v848_v31, %v1432_v37 }
 0x1cd   : > { %v850_v33 = vpop.f32.mrf.mxu1 }
 0x1ce   : > { %958 = vst [vmem:[%s1437_s21 + $0x108] sm:$0xff] %v849_v32  ;;  %v851_v35 = vadd.f32 %v850_v33, %v1430_v27 }
 0x1cf   : > { %v852_v36 = vpop.f32.mrf.mxu1 }
 0x1d0   : > { %959 = vst [vmem:[%s1437_s21 + $0x110] sm:$0xff] %v851_v35  ;;  %v853_v38 = vadd.f32 %v852_v36, %v1432_v37 }
 0x1d1   : > { %v856_v39 = vpop.f32.mrf.mxu1 }
 0x1d2   : > { %960 = vst [vmem:[%s1437_s21 + $0x118] sm:$0xff] %v853_v38  ;;  %v857_v40 = vadd.f32 %v856_v39, %v1430_v27 }
 0x1d3   : > { %v858_v41 = vpop.f32.mrf.mxu1 }
 0x1d4   : > { %961 = vst [vmem:[%s1437_s21 + $0x120] sm:$0xff] %v857_v40  ;;  %v859_v42 = vadd.f32 %v858_v41, %v1432_v37 }
 0x1d5   : > { %v860_v43 = vpop.f32.mrf.mxu1 }
 0x1d6   : > { %962 = vst [vmem:[%s1437_s21 + $0x128] sm:$0xff] %v859_v42  ;;  %v861_v44 = vadd.f32 %v860_v43, %v1430_v27 }
 0x1d7   : > { %v862_v45 = vpop.f32.mrf.mxu1 }
 0x1d8   : > { %963 = vst [vmem:[%s1437_s21 + $0x130] sm:$0xff] %v861_v44  ;;  %v863_v46 = vadd.f32 %v862_v45, %v1432_v37 }
 0x1d9   : > { %v866_v47 = vpop.f32.mrf.mxu1 }
 0x1da   : > { %964 = vst [vmem:[%s1437_s21 + $0x138] sm:$0xff] %v863_v46  ;;  %v867_v48 = vadd.f32 %v866_v47, %v1430_v27 }
 0x1db   : > { %v868_v49 = vpop.f32.mrf.mxu1 }
 0x1dc   : > { %965 = vst [vmem:[%s1437_s21 + $0x140] sm:$0xff] %v867_v48  ;;  %v869_v50 = vadd.f32 %v868_v49, %v1432_v37 }
 0x1dd   : > { %v870_v51 = vpop.f32.mrf.mxu1 }
 0x1de   : > { %966 = vst [vmem:[%s1437_s21 + $0x148] sm:$0xff] %v869_v50  ;;  %v871_v52 = vadd.f32 %v870_v51, %v1430_v27 }
 0x1df   : > { %v872_v53 = vpop.f32.mrf.mxu1 }
 0x1e0   : > { %967 = vst [vmem:[%s1437_s21 + $0x150] sm:$0xff] %v871_v52  ;;  %v873_v54 = vadd.f32 %v872_v53, %v1432_v37 }
 0x1e1   : > { %v876_v55 = vpop.f32.mrf.mxu1 }
 0x1e2   : > { %968 = vst [vmem:[%s1437_s21 + $0x158] sm:$0xff] %v873_v54  ;;  %v877_v56 = vadd.f32 %v876_v55, %v1430_v27 }
 0x1e3   : > { %v878_v57 = vpop.f32.mrf.mxu1 }
 0x1e4   : > { %969 = vst [vmem:[%s1437_s21 + $0x160] sm:$0xff] %v877_v56  ;;  %v879_v58 = vadd.f32 %v878_v57, %v1432_v37 }
 0x1e5   : > { %v880_v59 = vpop.f32.mrf.mxu1 }
 0x1e6   : > { %970 = vst [vmem:[%s1437_s21 + $0x168] sm:$0xff] %v879_v58  ;;  %v881_v60 = vadd.f32 %v880_v59, %v1430_v27 }
 0x1e7   : > { %v882_v61 = vpop.f32.mrf.mxu1 }
 0x1e8   : > { %971 = vst [vmem:[%s1437_s21 + $0x170] sm:$0xff] %v881_v60  ;;  %v883_v62 = vadd.f32 %v882_v61, %v1432_v37 }
 0x1e9   : > { %v886_v63 = vpop.f32.mrf.mxu1 }
 0x1ea   : > { %972 = vst [vmem:[%s1437_s21 + $0x178] sm:$0xff] %v883_v62  ;;  %v887_v0 = vadd.f32 %v886_v63, %v1430_v27 }
 0x1eb   : > { %v888_v1 = vpop.f32.mrf.mxu1 }
 0x1ec   : > { %973 = vst [vmem:[%s1437_s21 + $0x180] sm:$0xff] %v887_v0  ;;  %v889_v2 = vadd.f32 %v888_v1, %v1432_v37 }
 0x1ed   : > { %v890_v3 = vpop.f32.mrf.mxu1 }
 0x1ee   : > { %974 = vst [vmem:[%s1437_s21 + $0x188] sm:$0xff] %v889_v2  ;;  %v891_v4 = vadd.f32 %v890_v3, %v1430_v27 }
 0x1ef   : > { %v892_v5 = vpop.f32.mrf.mxu1 }
 0x1f0   : > { %975 = vst [vmem:[%s1437_s21 + $0x190] sm:$0xff] %v891_v4  ;;  %v893_v6 = vadd.f32 %v892_v5, %v1432_v37 }
 0x1f1   : > { %v896_v7 = vpop.f32.mrf.mxu1 }
 0x1f2   : > { %976 = vst [vmem:[%s1437_s21 + $0x198] sm:$0xff] %v893_v6  ;;  %v897_v8 = vadd.f32 %v896_v7, %v1430_v27 }
 0x1f3   : > { %v898_v9 = vpop.f32.mrf.mxu1 }
 0x1f4   : > { %977 = vst [vmem:[%s1437_s21 + $0x1a0] sm:$0xff] %v897_v8  ;;  %v899_v10 = vadd.f32 %v898_v9, %v1432_v37 }
 0x1f5   : > { %v900_v11 = vpop.f32.mrf.mxu1 }
 0x1f6   : > { %978 = vst [vmem:[%s1437_s21 + $0x1a8] sm:$0xff] %v899_v10  ;;  %v901_v12 = vadd.f32 %v900_v11, %v1430_v27 }
 0x1f7   : > { %v902_v13 = vpop.f32.mrf.mxu1 }
 0x1f8   : > { %979 = vst [vmem:[%s1437_s21 + $0x1b0] sm:$0xff] %v901_v12  ;;  %v903_v14 = vadd.f32 %v902_v13, %v1432_v37 }
 0x1f9   : > { %v906_v15 = vpop.f32.mrf.mxu1 }
 0x1fa   : > { %980 = vst [vmem:[%s1437_s21 + $0x1b8] sm:$0xff] %v903_v14  ;;  %v907_v16 = vadd.f32 %v906_v15, %v1430_v27 }
 0x1fb   : > { %v908_v17 = vpop.f32.mrf.mxu1 }
 0x1fc   : > { %981 = vst [vmem:[%s1437_s21 + $0x1c0] sm:$0xff] %v907_v16  ;;  %v909_v18 = vadd.f32 %v908_v17, %v1432_v37 }
 0x1fd   : > { %v910_v19 = vpop.f32.mrf.mxu1 }
 0x1fe   : > { %982 = vst [vmem:[%s1437_s21 + $0x1c8] sm:$0xff] %v909_v18  ;;  %v911_v20 = vadd.f32 %v910_v19, %v1430_v27 }
 0x1ff   : > { %v912_v21 = vpop.f32.mrf.mxu1 }
 0x200   : > { %983 = vst [vmem:[%s1437_s21 + $0x1d0] sm:$0xff] %v911_v20  ;;  %v913_v22 = vadd.f32 %v912_v21, %v1432_v37 }
 0x201   : > { %v916_v23 = vpop.f32.mrf.mxu1 }
 0x202   : > { %984 = vst [vmem:[%s1437_s21 + $0x1d8] sm:$0xff] %v913_v22  ;;  %v917_v24 = vadd.f32 %v916_v23, %v1430_v27 }
 0x203   : > { %v918_v25 = vpop.f32.mrf.mxu1 }
 0x204   : > { %985 = vst [vmem:[%s1437_s21 + $0x1e0] sm:$0xff] %v917_v24  ;;  %v919_v26 = vadd.f32 %v918_v25, %v1432_v37 }
 0x205   : > { %v920_v34 = vpop.f32.mrf.mxu1 }
 0x206   : > { %986 = vst [vmem:[%s1437_s21 + $0x1e8] sm:$0xff] %v919_v26  ;;  %v921_v28 = vadd.f32 %v920_v34, %v1430_v27 }
 0x207   : > { %v922_v29 = vpop.f32.mrf.mxu1 }
 0x208   : > { %987 = vst [vmem:[%s1437_s21 + $0x1f0] sm:$0xff] %v921_v28  ;;  %v923_v30 = vadd.f32 %v922_v29, %v1432_v37 }
 0x20a   : > { %988 = vst [vmem:[%s1437_s21 + $0x1f8] sm:$0xff] %v923_v30 }
 0x20b PF: > { %s15_s18 = sadd.s32 1, %s1238_s18  }
 0x20c   : > { %p12_p4 = scmp.ge.s32.totalorder %s15_s18, 4  }
 0x20e   :  { %14 = sbr.rel (!%p12_p4) target bundleno = 1 (0x1), region = 70 }

</bundles_post_ra>
